<compile_context>
chip_gen: v5e
topology: v5e:2x2
jax: 0.10.0
libtpu: 0.0.40
codegen_flags: <defaults>
</compile_context>

<pallas_src>
import jax
import jax.numpy as jnp
from jax.experimental import pallas as pl
from jax.experimental.pallas import tpu as pltpu


_TARGET_BLOCK_BYTES = 8 << 20   # ~8 MiB per block; in+out double-buffered = 32 MiB
_MAX_LANE_WIDTH = 2048          # cap on the lane (last) dim of the 2-D slab


def _silu_kernel(x_ref, o_ref):
    xf = x_ref[...].astype(jnp.float32)
    # jax.nn.sigmoid lowers to the logistic (exp + reciprocal) path on the EUP
    # slot; the kernel is HBM-bandwidth-bound so the compute is fully hidden.
    # f32 upcast is required on v5e (no bf16 VPU/EUP) and exact for f32 inputs.
    o_ref[...] = (xf * jax.nn.sigmoid(xf)).astype(o_ref.dtype)


def _sublane_multiple(itemsize: int) -> int:
    # Native sublane packing: f32 -> 8, bf16 -> 16, int8/fp8 -> 32.
    return {4: 8, 2: 16, 1: 32}.get(itemsize, 8)


def _round_down(v: int, m: int) -> int:
    return (v // m) * m


def _pick_lane_width(n: int):
    """Largest multiple of 128 that divides n (capped); None if n % 128 != 0."""
    if n % 128 != 0:
        return None
    m = n // 128
    for d in range(min(_MAX_LANE_WIDTH // 128, m), 0, -1):
        if m % d == 0:
            return 128 * d
    return 128


def _compiler_params(block_bytes: int) -> pltpu.CompilerParams:
    # in + out, double-buffered, plus headroom; capped well below v7x's
    # 64 MiB-per-TC VMEM (v5e/v6e have 128 MiB physical, so this is safe).
    vmem_limit = min(48 << 20, max(16 << 20, 4 * block_bytes + (8 << 20)))
    return pltpu.CompilerParams(
        dimension_semantics=("parallel",),
        vmem_limit_bytes=vmem_limit,
    )


def _cost(n: int, itemsize: int) -> pl.CostEstimate:
    return pl.CostEstimate(flops=2 * n, transcendentals=n,
                           bytes_accessed=2 * n * itemsize)


def _silu_2d(x2: jax.Array) -> jax.Array:
    rows, c = x2.shape
    itemsize = x2.dtype.itemsize
    sub = _sublane_multiple(itemsize)

    # Row tile so that block bytes ~= _TARGET_BLOCK_BYTES regardless of dtype.
    tr = min(max(1, _TARGET_BLOCK_BYTES // (c * itemsize)), rows)
    if tr < rows:
        tr = max(sub, _round_down(tr, sub))            # sublane divisibility rule
    elif rows >= 2 * sub:
        # Whole array would be one serialized grid step: split so the
        # "parallel" axis has >= 2 steps (both TCs on v7x + DMA/compute overlap).
        tr = max(sub, _round_down(pl.cdiv(rows, 2), sub))
    # else: tr == rows (full-dim block; legal even if rows % sub != 0)

    grid = (pl.cdiv(rows, tr),)                        # partial last block OK (elementwise)
    block_bytes = tr * c * itemsize

    return pl.pallas_call(
        _silu_kernel,
        out_shape=jax.ShapeDtypeStruct((rows, c), x2.dtype),
        grid_spec=pltpu.PrefetchScalarGridSpec(
            num_scalar_prefetch=0,
            grid=grid,
            in_specs=[pl.BlockSpec((tr, c), lambda i: (i, 0))],
            out_specs=pl.BlockSpec((tr, c), lambda i: (i, 0)),
        ),
        compiler_params=_compiler_params(block_bytes),
        cost_estimate=_cost(rows * c, itemsize),
    )(x2)


def _silu_1d(flat: jax.Array) -> jax.Array:
    """Ragged fallback (n not a multiple of 128): single 1-D call, no pad/slice."""
    (n,) = flat.shape
    itemsize = flat.dtype.itemsize
    if n >= 128:
        blk = min(n, 128 * 1024, max(128, _TARGET_BLOCK_BYTES // itemsize))
        blk = max(128, _round_down(blk, 128))          # lane divisibility rule
    else:
        blk = n                                        # full-dim block for tiny arrays
    grid = (pl.cdiv(n, blk),)                          # partial last block masked on store

    return pl.pallas_call(
        _silu_kernel,
        out_shape=jax.ShapeDtypeStruct((n,), flat.dtype),
        grid_spec=pltpu.PrefetchScalarGridSpec(
            num_scalar_prefetch=0,
            grid=grid,
            in_specs=[pl.BlockSpec((blk,), lambda i: (i,))],
            out_specs=pl.BlockSpec((blk,), lambda i: (i,))),
        compiler_params=_compiler_params(blk * itemsize),
        cost_estimate=_cost(n, itemsize),
    )(flat)


def silu(x: jax.Array) -> jax.Array:
    """SiLU over an arbitrary-shape array via a lane-dense (rows, C) slab.

    All reshapes here are bitcasts of a contiguous buffer: the kernel does
    exactly one HBM read and one HBM write of the data, nothing else.
    """
    orig_shape = x.shape
    n = x.size
    if n == 0:
        return x

    flat = x.reshape(-1)                               # bitcast, no copy
    c = _pick_lane_width(n)
    if c is not None:
        out = _silu_2d(flat.reshape(n // c, c))        # bitcast, no copy
    else:
        out = _silu_1d(flat)                           # rare ragged-size fallback
    return out.reshape(orig_shape)                     # bitcast, no copy


if __name__ == "__main__":
    key = jax.random.PRNGKey(0)
    # SiLU accepts arbitrary shapes; small 4-D tensor (batch of feature maps).
    x = jax.random.normal(key, (2, 4, 16, 16), dtype=jnp.float32)

    y = silu(x)
    y = jax.block_until_ready(y)

    # Reference check in plain JAX.
    y_ref = x * jax.nn.sigmoid(x)
    assert y.shape == x.shape and y.dtype == x.dtype
    assert jnp.allclose(y, y_ref, atol=1e-5, rtol=1e-5), "mismatch vs reference"

    print("KERNEL_OK")
</pallas_src>

<mosaic_0001>
module attributes {stable_mosaic.version = 11 : i64} {
  func.func @_silu_kernel(%arg0: i32, %arg1: memref<1x2048xf32, #tpu.memory_space<vmem>>, %arg2: memref<1x2048xf32, #tpu.memory_space<vmem>>) attributes {dimension_semantics = [#tpu.dimension_semantics<parallel>], iteration_bounds = array<i64: 1>, scalar_prefetch = 0 : i64, scratch_operands = 0 : i64, tpu.core_type = #tpu.core_type<tc>, window_params = [{transform_indices = @transform_0, window_bounds = array<i64: 1, 2048>}, {transform_indices = @transform_1, window_bounds = array<i64: 1, 2048>}]} {
    %c0 = arith.constant 0 : index
    %c0_0 = arith.constant 0 : index
    %0 = vector.load %arg1[%c0, %c0_0] : memref<1x2048xf32, #tpu.memory_space<vmem>>, vector<1x2048xf32>
    %1 = arith.negf %0 : vector<1x2048xf32>
    %2 = math.exp %1 : vector<1x2048xf32>
    %cst = arith.constant 1.000000e+00 : f32
    %3 = vector.broadcast %cst : f32 to vector<1x2048xf32>
    %4 = arith.addf %3, %2 : vector<1x2048xf32>
    %5 = arith.divf %3, %4 : vector<1x2048xf32>
    %6 = arith.mulf %0, %5 : vector<1x2048xf32>
    %c0_1 = arith.constant 0 : index
    %c0_2 = arith.constant 0 : index
    %7 = vector.load %arg2[%c0_1, %c0_2] : memref<1x2048xf32, #tpu.memory_space<vmem>>, vector<1x2048xf32>
    tpu.vector_store %arg2[%c0_1, %c0_2], %6 {strides = array<i32>} : memref<1x2048xf32, #tpu.memory_space<vmem>>, vector<1x2048xf32>,
    return
  }
  func.func @transform_0(%arg0: i32) -> (i32, i32) {
    %c0_i32 = arith.constant 0 : i32
    %c0_i32_0 = arith.constant 0 : i32
    return %arg0, %c0_i32 : i32, i32
  }
  func.func @transform_1(%arg0: i32) -> (i32, i32) {
    %c0_i32 = arith.constant 0 : i32
    %c0_i32_0 = arith.constant 0 : i32
    return %arg0, %c0_i32 : i32, i32
  }
}

</mosaic_0001>

<bundles_post_ra>
// kernel: tpu_custom_call.1
= control target key start
LH: loop header
LB: loop body
LE: loop exit
PB: predicated region body
PF: predicated region fallthrough
CT: control target
= control target key end

     0   :  { %6 = vsyncpa [#allocation3], 0  ;;  %s166_s0 = inlined_call_operand.hbm [shape: f32[1,2048], index: 0, kind: input, shape index: {}]   ;;  %s167_s1 = inlined_call_operand.hbm [shape: f32[1,2048], index: 1, kind: output, shape index: {}]  }
   0x1   :  { %7 = vsyncpa [#allocation4], 0  ;;  %s13_s8 = sshll.u32 %s166_s0, 4  ;;  %s148_s9 = smov [#allocation2]   ;;  %s14_s8 = int_to_ptr.hbm [resolvable:$true] %s13_s8 }
   0x2   :  { %s15_s10 = sshll.u32 %s148_s9, 4  ;;  %s16_s10 = int_to_ptr.vmem [resolvable:$true] %s15_s10 }
   0x3   :  { %18 = dma.hbm_to_vmem [thread:$0]  %s14_s8, 256, %s16_s10, [#allocation3]  }
   0x4   :  { %144 = dma.done.wait [#allocation3], 256  }
   0x5   :  { %145 = vsyncadd [#allocation3], 4294967040  ;;  %v23_v0 = vld [vmem:[#allocation2] sm:$0xff]  ;;  %v24_v1 = vld [vmem:[#allocation2 + $0x8] sm:$0xff]  ;;  %s149_s0 = smov [#allocation5]   ;;  %s74_s14 = sshll.u32 %s167_s1, 4  ;;  %s75_s14 = int_to_ptr.hbm [resolvable:$true] %s74_s14 }
   0x6   :  { %v84_v2 = vmul.f32 -1.442695, %v23_v0  ;;  %v85_v3 = vmul.f32 -1.442695, %v24_v1  ;;  %s72_s11 = sshll.u32 %s149_s0, 4  ;;  %s73_s11 = int_to_ptr.vmem [resolvable:$true] %s72_s11 }
   0x8   :  { %88 = vpow2.f32 %v84_v2 }
   0x9   :  { %90 = vpow2.f32 %v85_v3 }
   0xe   :  { %v89_v4 = vpop.eup %88 }
   0xf   :  { %v91_v5 = vpop.eup %90  ;;  %v31_v6 = vadd.f32 1.0, %v89_v4 }
  0x10   :  { %v32_v7 = vadd.f32 1.0, %v91_v5 }
  0x11   :  { %92 = vrcp.f32 %v31_v6  ;;  %vm38_vm0 = vweird.f32 %v31_v6  ;;  %v44_v11 = vand.u32 2147483648, %v31_v6  ;;  %v42_v14 = vand.u32 2147483647, %v31_v6 }
  0x12   :  { %94 = vrcp.f32 %v32_v7  ;;  %v59_v15 = vand.u32 2147483648, %v32_v7  ;;  %vm53_vm2 = vweird.f32 %v32_v7  ;;  %v57_v17 = vand.u32 2147483647, %v32_v7 }
  0x13   :  { %v45_v19 = vor.u32 1.1754944e-38, %v44_v11  ;;  %vm43_vm5 = vcmp.eq.f32.partialorder %v42_v14, 8.507059e+37 }
  0x14   :  { %v60_v22 = vor.u32 1.1754944e-38, %v59_v15  ;;  %vm58_vm7 = vcmp.eq.f32.partialorder %v57_v17, 8.507059e+37 }
  0x17   :  { %v93_v8 = vpop.eup %92 }
  0x18   :  { %v95_v9 = vpop.eup %94  ;;  %v34_v10 = vmul.f32 %v93_v8, %v31_v6  ;;  %vm39_vm1 = vweird.f32 %v93_v8 }
  0x19   :  { %v49_v12 = vmul.f32 %v95_v9, %v32_v7  ;;  %vm54_vm3 = vweird.f32 %v95_v9  ;;  %vm40_vm4 = vmor %vm38_vm0, %vm39_vm1 }
  0x1a   :  { %v35_v13 = vsub.f32 1.0, %v34_v10  ;;  %vm55_vm6 = vmor %vm53_vm2, %vm54_vm3 }
  0x1b   :  { %v50_v16 = vsub.f32 1.0, %v49_v12 }
  0x1c   :  { %v36_v18 = vmul.f32 %v93_v8, %v35_v13 }
  0x1d   :  { %v51_v20 = vmul.f32 %v95_v9, %v50_v16 }
  0x1e   :  { %v37_v21 = vadd.f32 %v93_v8, %v36_v18 }
  0x1f   :  { %v52_v23 = vadd.f32 %v95_v9, %v51_v20 }
  0x20   :  { %v41_v24 = vsel %vm40_vm4, %v93_v8, %v37_v21 }
  0x21   :  { %v46_v25 = vsel %vm43_vm5, %v45_v19, %v41_v24  ;;  %v56_v26 = vsel %vm55_vm6, %v95_v9, %v52_v23 }
  0x22   :  { %v63_v27 = vmul.f32 %v46_v25, %v23_v0  ;;  %v61_v28 = vsel %vm58_vm7, %v60_v22, %v56_v26 }
  0x23   :  { %v64_v29 = vmul.f32 %v61_v28, %v24_v1 }
  0x24   :  { %65 = vst [vmem:[#allocation5] sm:$0xff] %v63_v27 }
  0x25   :  { %66 = vst [vmem:[#allocation5 + $0x8] sm:$0xff] %v64_v29 }
  0x26   :  { %77 = dma.vmem_to_hbm [thread:$0]  %s73_s11, 256, %s75_s14, [#allocation4]  }
  0x27   :  { %146 = dma.done.wait [#allocation4], 256  }
  0x28   :  { %147 = vsyncadd [#allocation4], 4294967040 }
  0x29   :  { %82 = vsyncpa [#allocation3], 1 }
  0x2a   :  { %83 = vsyncpa [#allocation4], 1 }

</bundles_post_ra>
